<compile_context>
chip_gen: v7x
topology: tpu7x:2x2x1
jax: 0.10.0
libtpu: 0.0.40
codegen_flags: <defaults>
</compile_context>

<pallas_src>
import jax
import jax.numpy as jnp
from jax import lax
from jax.experimental import pallas as pl
from jax.experimental.pallas import tpu as pltpu

EPS = 1e-5
TARGET_BLOCK_BYTES = 4 << 20          # ~4 MiB input tiles for the streamed passes
RESIDENT_BYTES = 4 << 20              # x below this -> single-call VMEM-resident path
VMEM_LIMIT_BYTES = 32 * 1024 * 1024   # explicit budget; safe on v5e / v6e / v7x
N_SPLITS = 2                          # stats-pass splits (one per v7x TensorCore)


def _make_resident_kernel(g, D, inv_m):
    """Single-call path: stats + normalize with x resident in VMEM (1 HBM read)."""

    def kernel(x_ref, w_ref, b_ref, o_ref):
        x = x_ref[...].astype(jnp.float32)                # (m_packed, g*D)
        s = jnp.sum(x, axis=0, keepdims=True)             # (1, g*D)
        sq = jnp.sum(x * x, axis=0, keepdims=True)
        # Combine the g packed lane groups per feature (static lane slices).
        s_tot, sq_tot = s[:, :D], sq[:, :D]
        for j in range(1, g):
            s_tot = s_tot + s[:, j * D:(j + 1) * D]
            sq_tot = sq_tot + sq[:, j * D:(j + 1) * D]
        mean = s_tot * inv_m
        var = sq_tot * inv_m - mean * mean                # biased var, E[x^2]-mean^2
        inv_std = lax.rsqrt(var + EPS)
        scale = w_ref[...] * inv_std                      # (1, D)
        shift = b_ref[...] - mean * scale
        if g > 1:                                         # back to packed lane width
            scale = jnp.concatenate([scale] * g, axis=1)
            shift = jnp.concatenate([shift] * g, axis=1)
        o_ref[...] = (x * scale + shift).astype(o_ref.dtype)

    return kernel


def _make_stats_kernel(tiles_per_split, tm, m_packed, needs_mask):
    """Pass 1: per-split raw sum / sum-of-squares over row tiles (packed lanes)."""

    def kernel(x_ref, sum_ref, sq_ref):
        s_idx = pl.program_id(0)
        t_idx = pl.program_id(1)

        @pl.when(t_idx == 0)
        def _init():
            sum_ref[...] = jnp.zeros_like(sum_ref)
            sq_ref[...] = jnp.zeros_like(sq_ref)

        x = x_ref[...].astype(jnp.float32)
        if needs_mask:
            # Mask rows past the true row count (ragged last tile / duplicated
            # clamped tiles of the split grid) so stats stay exact without jnp.pad.
            gt = s_idx * tiles_per_split + t_idx          # global tile index
            row = lax.broadcasted_iota(jnp.int32, x.shape, 0)
            x = jnp.where(gt * tm + row < m_packed, x, 0.0)
        sum_ref[0:1, :] += jnp.sum(x, axis=0, keepdims=True)
        sq_ref[0:1, :] += jnp.sum(x * x, axis=0, keepdims=True)

    return kernel


def _normalize_kernel(x_ref, scale_ref, shift_ref, o_ref):
    """Pass 2: y = x * scale + shift (affine fused into precomputed scale/shift)."""
    x = x_ref[...].astype(jnp.float32)
    o_ref[...] = (x * scale_ref[...] + shift_ref[...]).astype(o_ref.dtype)


def normalization_forward(x, weight, bias, *, block_rows=None):
    """BatchNorm1d (training-mode batch stats, affine) over x: (B, N, D)."""
    B, N, D = x.shape
    M = B * N
    itemsize = jnp.dtype(x.dtype).itemsize

    # Lane-dense packing: view (M, D) as (M/g, g*D = 128) when it divides cleanly.
    # TODO(synk): generalize packing to feature widths with 128 % D != 0 (pad the
    # dead lanes / arbitrary-shift combines) to avoid masked partial stores there.
    if D < 128 and 128 % D == 0 and M % (128 // D) == 0:
        g = 128 // D
    else:
        g = 1
    W = g * D
    m_packed = M // g
    xp = x.reshape(m_packed, W)          # pure view-reshape, no HBM copy
    inv_m = 1.0 / float(M)               # global row count, NOT per-tile rows

    # ---------- Resident fast path: x fits in VMEM -> 1 call, 1 HBM read. --------
    if block_rows is None and M * D * itemsize <= RESIDENT_BYTES:
        w2d = weight.astype(jnp.float32).reshape(1, D)
        b2d = bias.astype(jnp.float32).reshape(1, D)
        vmem = pl.BlockSpec(memory_space=pltpu.MemorySpace.VMEM)
        yp = pl.pallas_call(
            _make_resident_kernel(g, D, inv_m),
            out_shape=jax.ShapeDtypeStruct((m_packed, W), x.dtype),
            in_specs=[vmem, vmem, vmem],
            out_specs=vmem,
            compiler_params=pltpu.CompilerParams(
                vmem_limit_bytes=VMEM_LIMIT_BYTES),
        )(xp, w2d, b2d)
        return yp.reshape(B, N, D)

    # ---------- Tiled two-pass path (large inputs). -------------------------------
    if block_rows is not None:
        tm = max(8, (block_rows // 8) * 8)
    else:
        tm = max(8, (TARGET_BLOCK_BYTES // (W * itemsize)) // 8 * 8)
    if tm >= m_packed:
        tm = m_packed                     # full-extent block is always legal
    nt = pl.cdiv(m_packed, tm)

    n_splits = N_SPLITS if nt >= N_SPLITS else 1
    tiles_per_split = pl.cdiv(nt, n_splits)
    needs_mask = (n_splits * tiles_per_split * tm) != m_packed

    # Pass 1: per-split partial sums. Leading axis "parallel" -> both v7x
    # TensorCores stream half the read traffic; reduction axis stays "arbitrary".
    # Each split owns an 8-row output block (row 0 carries data, rows 1..7 zero)
    # to keep the sublane block dim a multiple of 8.
    sums, sqs = pl.pallas_call(
        _make_stats_kernel(tiles_per_split, tm, m_packed, needs_mask),
        out_shape=(jax.ShapeDtypeStruct((n_splits * 8, W), jnp.float32),
                   jax.ShapeDtypeStruct((n_splits * 8, W), jnp.float32)),
        grid=(n_splits, tiles_per_split),
        in_specs=[pl.BlockSpec(
            (tm, W),
            lambda s, t: (jnp.minimum(s * tiles_per_split + t, nt - 1), 0))],
        out_specs=(pl.BlockSpec((8, W), lambda s, t: (s, 0)),
                   pl.BlockSpec((8, W), lambda s, t: (s, 0))),
        compiler_params=pltpu.CompilerParams(
            dimension_semantics=("parallel", "arbitrary"),
            vmem_limit_bytes=VMEM_LIMIT_BYTES),
    )(xp)

    # Tiny XLA epilogue on (n_splits*8, W) arrays: combine split + lane-group
    # partials and fuse the affine params into one scale/shift per feature.
    s_tot = jnp.sum(sums.reshape(-1, D), axis=0)
    sq_tot = jnp.sum(sqs.reshape(-1, D), axis=0)
    mean = s_tot * inv_m
    var = sq_tot * inv_m - mean * mean
    inv_std = lax.rsqrt(var + EPS)
    scale_d = weight.astype(jnp.float32) * inv_std
    shift_d = bias.astype(jnp.float32) - mean * scale_d
    scale = jnp.tile(scale_d.reshape(1, D), (1, g))      # (1, W) packed layout
    shift = jnp.tile(shift_d.reshape(1, D), (1, g))

    # Pass 2: y = x * scale + shift. Tiles independent -> "parallel" (megacore).
    # Ragged last tile: out-of-bounds output rows are dropped by Pallas writeback.
    yp = pl.pallas_call(
        _normalize_kernel,
        out_shape=jax.ShapeDtypeStruct((m_packed, W), x.dtype),
        grid=(nt,),
        in_specs=[pl.BlockSpec((tm, W), lambda i: (i, 0)),
                  pl.BlockSpec((1, W), lambda i: (0, 0)),
                  pl.BlockSpec((1, W), lambda i: (0, 0))],
        out_specs=pl.BlockSpec((tm, W), lambda i: (i, 0)),
        compiler_params=pltpu.CompilerParams(
            dimension_semantics=("parallel",),
            vmem_limit_bytes=VMEM_LIMIT_BYTES),
    )(xp, scale, shift)

    return yp.reshape(B, N, D)


def reference_forward(x, weight, bias):
    B, N, D = x.shape
    x2d = x.reshape(B * N, D).astype(jnp.float32)
    mean = jnp.mean(x2d, axis=0, keepdims=True)
    var = jnp.mean((x2d - mean) ** 2, axis=0, keepdims=True)
    y = (x2d - mean) / jnp.sqrt(var + EPS) * weight.reshape(1, D) + bias.reshape(1, D)
    return y.reshape(B, N, D).astype(x.dtype)


if __name__ == "__main__":
    key = jax.random.PRNGKey(0)
    kx, kw, kb, kx2, kx3 = jax.random.split(key, 5)

    # Small shape consistent with the module: batch=2, graph nodes=8, embed_dim=32.
    B, N, D = 2, 8, 32
    x = jax.random.normal(kx, (B, N, D), dtype=jnp.float32)

    # Affine-param init mirroring Normalization.init_parameters():
    # uniform(-stdv, stdv) with stdv = 1/sqrt(param.size(-1)) = 1/sqrt(D).
    stdv = 1.0 / (D ** 0.5)
    weight = jax.random.uniform(kw, (D,), minval=-stdv, maxval=stdv, dtype=jnp.float32)
    bias = jax.random.uniform(kb, (D,), minval=-stdv, maxval=stdv, dtype=jnp.float32)

    # 1) Resident single-call path (the module's real regime).
    out = jax.block_until_ready(normalization_forward(x, weight, bias))
    ref = reference_forward(x, weight, bias)
    assert out.shape == (B, N, D)
    assert jnp.max(jnp.abs(out - ref)) < 2e-4, "mismatch (resident path)"

    # 2) Tiled two-pass path, lane-packed, evenly divisible tiles.
    B2, N2 = 4, 64
    x2 = jax.random.normal(kx2, (B2, N2, D), dtype=jnp.float32)
    out2 = jax.block_until_ready(
        normalization_forward(x2, weight, bias, block_rows=16))
    ref2 = reference_forward(x2, weight, bias)
    assert jnp.max(jnp.abs(out2 - ref2)) < 2e-4, "mismatch (tiled packed path)"

    # 3) Tiled path with ragged row count (in-kernel masking + dropped OOB writes).
    B3, N3 = 3, 37
    x3 = jax.random.normal(kx3, (B3, N3, D), dtype=jnp.float32)
    out3 = jax.block_until_ready(
        normalization_forward(x3, weight, bias, block_rows=8))
    ref3 = reference_forward(x3, weight, bias)
    assert jnp.max(jnp.abs(out3 - ref3)) < 2e-4, "mismatch (ragged tiled path)"

    # TODO(synk): running_mean/running_var tracking (eval-mode BatchNorm1d) and the
    # 'instance' normalization branch are not modeled; only training-mode batch
    # statistics of the default 'batch' path are implemented.
    print("KERNEL_OK")
</pallas_src>

<mosaic_0001>
module attributes {stable_mosaic.version = 11 : i64} {
  func.func @kernel(%arg0: memref<4x128xf32, #tpu.memory_space<vmem>>, %arg1: memref<1x32xf32, #tpu.memory_space<vmem>>, %arg2: memref<1x32xf32, #tpu.memory_space<vmem>>, %arg3: memref<4x128xf32, #tpu.memory_space<vmem>>) attributes {dimension_semantics = [], scalar_prefetch = 0 : i64, scratch_operands = 0 : i64, tpu.core_type = #tpu.core_type<tc>} {
    %c0 = arith.constant 0 : index
    %c0_0 = arith.constant 0 : index
    %0 = vector.load %arg0[%c0, %c0_0] : memref<4x128xf32, #tpu.memory_space<vmem>>, vector<4x128xf32>
    %cst = arith.constant dense<0.000000e+00> : vector<128xf32>
    %1 = vector.multi_reduction <add>, %0, %cst [0] : vector<4x128xf32> to vector<128xf32>
    %2 = vector.shape_cast %1 : vector<128xf32> to vector<1x128xf32>
    %3 = arith.mulf %0, %0 : vector<4x128xf32>
    %cst_1 = arith.constant dense<0.000000e+00> : vector<128xf32>
    %4 = vector.multi_reduction <add>, %3, %cst_1 [0] : vector<4x128xf32> to vector<128xf32>
    %5 = vector.shape_cast %4 : vector<128xf32> to vector<1x128xf32>
    %6 = vector.extract_strided_slice %2 {offsets = [0, 0], sizes = [1, 32], strides = [1, 1]} : vector<1x128xf32> to vector<1x32xf32>
    %7 = vector.extract_strided_slice %5 {offsets = [0, 0], sizes = [1, 32], strides = [1, 1]} : vector<1x128xf32> to vector<1x32xf32>
    %8 = vector.extract_strided_slice %2 {offsets = [0, 32], sizes = [1, 32], strides = [1, 1]} : vector<1x128xf32> to vector<1x32xf32>
    %9 = arith.addf %6, %8 : vector<1x32xf32>
    %10 = vector.extract_strided_slice %5 {offsets = [0, 32], sizes = [1, 32], strides = [1, 1]} : vector<1x128xf32> to vector<1x32xf32>
    %11 = arith.addf %7, %10 : vector<1x32xf32>
    %12 = vector.extract_strided_slice %2 {offsets = [0, 64], sizes = [1, 32], strides = [1, 1]} : vector<1x128xf32> to vector<1x32xf32>
    %13 = arith.addf %9, %12 : vector<1x32xf32>
    %14 = vector.extract_strided_slice %5 {offsets = [0, 64], sizes = [1, 32], strides = [1, 1]} : vector<1x128xf32> to vector<1x32xf32>
    %15 = arith.addf %11, %14 : vector<1x32xf32>
    %16 = vector.extract_strided_slice %2 {offsets = [0, 96], sizes = [1, 32], strides = [1, 1]} : vector<1x128xf32> to vector<1x32xf32>
    %17 = arith.addf %13, %16 : vector<1x32xf32>
    %18 = vector.extract_strided_slice %5 {offsets = [0, 96], sizes = [1, 32], strides = [1, 1]} : vector<1x128xf32> to vector<1x32xf32>
    %19 = arith.addf %15, %18 : vector<1x32xf32>
    %cst_2 = arith.constant 6.250000e-02 : f32
    %20 = vector.broadcast %cst_2 : f32 to vector<1x32xf32>
    %21 = arith.mulf %17, %20 : vector<1x32xf32>
    %cst_3 = arith.constant 6.250000e-02 : f32
    %22 = vector.broadcast %cst_3 : f32 to vector<1x32xf32>
    %23 = arith.mulf %19, %22 : vector<1x32xf32>
    %24 = arith.mulf %21, %21 : vector<1x32xf32>
    %25 = arith.subf %23, %24 : vector<1x32xf32>
    %cst_4 = arith.constant 9.99999974E-6 : f32
    %26 = vector.broadcast %cst_4 : f32 to vector<1x32xf32>
    %27 = arith.addf %25, %26 : vector<1x32xf32>
    %28 = math.rsqrt %27 : vector<1x32xf32>
    %c0_5 = arith.constant 0 : index
    %c0_6 = arith.constant 0 : index
    %29 = vector.load %arg1[%c0_5, %c0_6] : memref<1x32xf32, #tpu.memory_space<vmem>>, vector<1x32xf32>
    %30 = arith.mulf %29, %28 : vector<1x32xf32>
    %c0_7 = arith.constant 0 : index
    %c0_8 = arith.constant 0 : index
    %31 = vector.load %arg2[%c0_7, %c0_8] : memref<1x32xf32, #tpu.memory_space<vmem>>, vector<1x32xf32>
    %32 = arith.mulf %21, %30 : vector<1x32xf32>
    %33 = arith.subf %31, %32 : vector<1x32xf32>
    %34 = tpu.concatenate %30, %30, %30, %30 in 1 : vector<1x32xf32>, vector<1x32xf32>, vector<1x32xf32>, vector<1x32xf32> -> vector<1x128xf32>
    %35 = tpu.concatenate %33, %33, %33, %33 in 1 : vector<1x32xf32>, vector<1x32xf32>, vector<1x32xf32>, vector<1x32xf32> -> vector<1x128xf32>
    %36 = vector.broadcast %34 : vector<1x128xf32> to vector<4x128xf32>
    %37 = arith.mulf %0, %36 : vector<4x128xf32>
    %38 = vector.broadcast %35 : vector<1x128xf32> to vector<4x128xf32>
    %39 = arith.addf %37, %38 : vector<4x128xf32>
    %c0_9 = arith.constant 0 : index
    %c0_10 = arith.constant 0 : index
    %40 = vector.load %arg3[%c0_9, %c0_10] : memref<4x128xf32, #tpu.memory_space<vmem>>, vector<4x128xf32>
    tpu.vector_store %arg3[%c0_9, %c0_10], %39 {strides = array<i32>} : memref<4x128xf32, #tpu.memory_space<vmem>>, vector<4x128xf32>,
    return
  }
}

</mosaic_0001>

<bundles_post_ra>
// kernel: tpu_custom_call.1
= control target key start
LH: loop header
LB: loop body
LE: loop exit
PB: predicated region body
PF: predicated region fallthrough
CT: control target
= control target key end

     0   :  { %8 = vsyncpa [#allocation3], 0  ;;  %s272_s0 = inlined_call_operand.hbm [shape: f32[4,128], index: 0, kind: input, shape index: {}]   ;;  %s273_s1 = inlined_call_operand.vmem [shape: f32[1,32], index: 1, kind: input, shape index: {}]   ;;  %s274_s2 = inlined_call_operand.vmem [shape: f32[1,32], index: 2, kind: input, shape index: {}]   ;;  %s275_s3 = inlined_call_operand.hbm [shape: f32[4,128], index: 3, kind: output, shape index: {}]  }
   0x1   :  { %9 = vsyncpa [#allocation4], 0  ;;  %s199_s12 = smov [#allocation2]   ;;  %s151_s16 = scalar_lea.hbm %s272_s0, 64 }
   0x2   :  { %s16_s13 = sshll.u32 %s199_s12, 4  ;;  %p152_p0 = scmp.ne.s32.totalorder %s272_s0, %s151_s16  ;;  %s17_s13 = int_to_ptr.vmem [resolvable:$true] %s16_s13 }
   0x3   :  { %p155_p1 = scmp.lt.u32.totalorder %s151_s16, %s272_s0 }
   0x5   :  { %p157_p2 = pnand %p155_p1, %p152_p0 }
   0x7   :  { %160 = shalt.err (!%p157_p2)
}
   0x8   :  { %s161_s21 = scalar_lea.vmem %s17_s13, 64  ;;  %p166_p4 = scmp.lt.s32.totalorder %s17_s13, %s17_s13 }
   0x9   :  { %p162_p3 = scmp.ne.s32.totalorder %s17_s13, %s161_s21  ;;  %p167_p5 = scmp.lt.s32.totalorder %s161_s21, %s161_s21 }
   0xb   :  { %p168_p6 = por %p167_p5, %p166_p4 }
   0xd   :  { %p169_p7 = pnand %p168_p6, %p162_p3 }
   0xf   :  { %172 = shalt.err (!%p169_p7)
}
  0x10   :  { %19 = dma.hbm_to_vmem [thread:$0]  %s272_s0, 64, %s17_s13, [#allocation3]  }
  0x11   :  { %195 = dma.done.wait [#allocation3], 64  }
  0x12   :  { %196 = vsyncadd [#allocation3], 4294967232  ;;  %vm28_vm0 = vcmask 1043456   ;;  %v236_v0 = vld [vmem:[#allocation2] sm:$0xf]  ;;  %s200_s0 = smov 64   ;;  %v82_v33 = vlaneseq }
  0x13   :  { %v29_v1 = vsel %vm28_vm0, %v236_v0, 0.0  ;;  %v36_v2 = vmul.f32 %v236_v0, %v236_v0  ;;  %s201_s24 = smov 96   ;;  %s202_s25 = smov 32   ;;  %v76_v35 = vld [vmem:[%s273_s1] sm:$0x1]  ;;  %vm95_vm1 = vcmask 261120  }
  0x14   :  { %v30_v3 = vrot.slane %v29_v1, 4  ;;  %v83_v34 = vshrl.u32 %v82_v33, 7  ;;  %v78_v39 = vld [vmem:[%s274_s2] sm:$0x1]  ;;  %vm97_vm2 = vcmask 523264   ;;  %vm99_vm3 = vcmask 785408  }
  0x15   :  { %v37_v4 = vsel %vm28_vm0, %v36_v2, 0.0  ;;  %s203_s1 = smov [#allocation5]  }
  0x16   :  { %v31_v5 = vadd.f32 %v30_v3, %v29_v1  ;;  %v38_v6 = vrot.slane %v37_v4, 4  ;;  %v84_v36 = vsub.s32 0, %v83_v34  ;;  %s135_s2 = sshll.u32 %s203_s1, 4  ;;  %s136_s2 = int_to_ptr.vmem [resolvable:$true] %s135_s2 }
  0x17   :  { %s173_s30 = scalar_lea.vmem %s136_s2, 64  ;;  %p178_p9 = scmp.lt.s32.totalorder %s136_s2, %s136_s2 }
  0x18   :  { %v32_v7 = vrot.slane %v31_v5, 2  ;;  %v39_v8 = vadd.f32 %v38_v6, %v37_v4  ;;  %p174_p8 = scmp.ne.s32.totalorder %s136_s2, %s173_s30  ;;  %p179_p10 = scmp.lt.s32.totalorder %s173_s30, %s173_s30 }
  0x1a   :  { %v33_v9 = vadd.f32 %v32_v7, %v31_v5  ;;  %v40_v10 = vrot.slane %v39_v8, 2  ;;  %p180_p11 = por %p179_p10, %p178_p9 }
  0x1c   :  { %v34_v11 = vrot.slane %v33_v9, 1  ;;  %v41_v12 = vadd.f32 %v40_v10, %v39_v8  ;;  %p181_p12 = pnand %p180_p11, %p174_p8 }
  0x1e   :  { %v35_v13 = vadd.f32 %v34_v11, %v33_v9  ;;  %v42_v14 = vrot.slane %v41_v12, 1 }
  0x20   :  { %54 = vrot.lane.b32.xlu1 %v35_v13, %s200_s0  ;;  %45 = vrot.lane.b32.xlu0 %v35_v13, %s201_s24  ;;  %v43_v15 = vadd.f32 %v42_v14, %v41_v12 }
  0x24   :  { %58 = vrot.lane.b32.xlu1 %v43_v15, %s200_s0  ;;  %50 = vrot.lane.b32.xlu0 %v43_v15, %s201_s24 }
  0x28   :  { %66 = vrot.lane.b32.xlu1 %v43_v15, %s202_s25  ;;  %62 = vrot.lane.b32.xlu0 %v35_v13, %s202_s25 }
  0x92   :  { %v55_v16 = vpop.permute.xlu1 %54  ;;  %v46_v17 = vpop.permute.xlu0 %45 }
  0x93   :  { %v48_v18 = vadd.f32 %v46_v17, %v35_v13 }
  0x95   :  { %v57_v23 = vadd.f32 %v55_v16, %v48_v18 }
  0x96   :  { %v59_v19 = vpop.permute.xlu1 %58  ;;  %v51_v20 = vpop.permute.xlu0 %50 }
  0x97   :  { %v53_v21 = vadd.f32 %v51_v20, %v43_v15 }
  0x99   :  { %v61_v22 = vadd.f32 %v59_v19, %v53_v21 }
  0x9a   :  { %v67_v24 = vpop.permute.xlu1 %66  ;;  %v63_v25 = vpop.permute.xlu0 %62 }
  0x9b   :  { %v69_v26 = vadd.f32 %v67_v24, %v61_v22  ;;  %v65_v27 = vadd.f32 %v63_v25, %v57_v23 }
  0x9d   :  { %v70_v28 = vmul.f32 0.0625, %v65_v27  ;;  %v71_v29 = vmul.f32 0.0625, %v69_v26 }
  0x9f   :  { %v72_v30 = vmul.f32 %v70_v28, %v70_v28 }
  0xa1   :  { %v73_v31 = vsub.f32 %v71_v29, %v72_v30 }
  0xa3   :  { %v74_v32 = vadd.f32 1e-05, %v73_v31 }
  0xa5   :  { %149 = vrsqrt.f32 %v74_v32 }
  0xaf   :  { %v150_v37 = vpop.eup %149 }
  0xb0   :  { %v77_v38 = vmul.f32 %v150_v37, %v76_v35 }
  0xb2   :  { %v79_v40 = vmul.f32 %v77_v38, %v70_v28  ;;  %v85_v41 = vrot.slane %v77_v38, %v84_v36 }
  0xb4   :  { %v80_v42 = vsub.f32 %v78_v39, %v79_v40  ;;  %89 = vrot.lane.b32.xlu1 %v85_v41, %s200_s0  ;;  %86 = vrot.lane.b32.xlu0 %v85_v41, %s202_s25 }
  0xb6   :  { %v105_v43 = vrot.slane %v80_v42, %v84_v36 }
  0xb8   :  { %92 = vrot.lane.b32.xlu0 %v85_v41, %s201_s24  ;;  %106 = vrot.lane.b32.xlu1 %v105_v43, %s202_s25 }
  0xbc   :  { %109 = vrot.lane.b32.xlu0 %v105_v43, %s200_s0  ;;  %112 = vrot.lane.b32.xlu1 %v105_v43, %s201_s24 }
 0x126   :  { %v90_v44 = vpop.permute.xlu1 %89  ;;  %v87_v45 = vpop.permute.xlu0 %86 }
 0x127   :  { %v96_v46 = vsel %vm95_vm1, %v77_v38, %v87_v45 }
 0x128   :  { %v98_v47 = vsel %vm97_vm2, %v96_v46, %v90_v44 }
 0x12a   :  { %v93_v48 = vpop.permute.xlu0 %92  ;;  %v107_v49 = vpop.permute.xlu1 %106 }
 0x12b   :  { %v100_v50 = vsel %vm99_vm3, %v98_v47, %v93_v48  ;;  %v115_v52 = vsel %vm95_vm1, %v80_v42, %v107_v49 }
 0x12c   :  { %v121_v51 = vrot.slane %v100_v50, %v84_v36 }
 0x12e   :  { %v110_v53 = vpop.permute.xlu0 %109  ;;  %v113_v54 = vpop.permute.xlu1 %112  ;;  %v122_v57 = vmul.f32 %v121_v51, %v236_v0 }
 0x12f   :  { %v116_v55 = vsel %vm97_vm2, %v115_v52, %v110_v53 }
 0x130   :  { %v117_v56 = vsel %vm99_vm3, %v116_v55, %v113_v54 }
 0x131   :  { %v126_v58 = vrot.slane %v117_v56, %v84_v36 }
 0x133   :  { %v127_v59 = vadd.f32 %v126_v58, %v122_v57 }
 0x135   :  { %128 = vst [vmem:[#allocation5] sm:$0xf] %v127_v59 }
 0x136   :  { %184 = shalt.err (!%p181_p12)
}
 0x137   :  { %s185_s6 = scalar_lea.hbm %s275_s3, 64 }
 0x138   :  { %p186_p13 = scmp.ne.s32.totalorder %s275_s3, %s185_s6  ;;  %p189_p0 = scmp.lt.u32.totalorder %s185_s6, %s275_s3 }
 0x13a   :  { %p191_p1 = pnand %p189_p0, %p186_p13 }
 0x13c   :  { %194 = shalt.err (!%p191_p1)
}
 0x13d   :  { %138 = dma.vmem_to_hbm [thread:$0]  %s136_s2, 64, %s275_s3, [#allocation4]  }
 0x13e   :  { %197 = dma.done.wait [#allocation4], 64  }
 0x13f   :  { %198 = vsyncadd [#allocation4], 4294967232 }
 0x140   :  { %142 = vsyncpa [#allocation3], 1 }
 0x141   :  { %143 = vsyncpa [#allocation4], 1 }

</bundles_post_ra>
